<compile_context>
chip_gen: v5e
topology: v5e:2x2
jax: 0.10.0
libtpu: 0.0.40
codegen_flags: <defaults>
</compile_context>

<pallas_src>
import jax
import jax.numpy as jnp
from jax import lax
from jax.experimental import pallas as pl
from jax.experimental.pallas import tpu as pltpu


_CHUNK_ROWS = 1024               # rows per in-kernel compute sub-chunk
_X_TILE_TARGET_BYTES = 2 << 20   # ~2 MiB streamed x tile per grid step
_X_TILE_MAX_BYTES = 4 << 20      # hard cap on the streamed x tile


def _make_kernel(chunks):
    """chunks: static tuple of (row_start, row_count) covering one batch tile."""

    def kernel(x_ref, w1_ref, w2_ref, w3_ref, b1_ref, b2_ref, b3_ref, o_ref):
        b3 = b3_ref[0, 0]        # SMEM scalar
        b1 = b1_ref[...]         # (1, 40) f32, VMEM-resident
        b2 = b2_ref[...]         # (1, 20) f32, VMEM-resident
        w3 = w3_ref[...]         # (1, 20) f32, VMEM-resident

        # Static unroll over sub-chunks: static slices, small live intermediates.
        for start, rows in chunks:
            # fc1 + ReLU.  x streams in its original dtype; the bf16 cast for
            # the MXU happens here (VALU has huge slack in this HBM-bound kernel).
            xb = x_ref[pl.ds(start, rows), :].astype(w1_ref.dtype)
            h1 = jnp.dot(xb, w1_ref[...], preferred_element_type=jnp.float32)
            h1 = jnp.maximum(h1 + b1, 0.0)

            # fc2 + ReLU.
            h2 = jnp.dot(h1.astype(w2_ref.dtype), w2_ref[...],
                         preferred_element_type=jnp.float32)
            h2 = jnp.maximum(h2 + b2, 0.0)

            # dropout(p=0.3): identity in eval/inference mode.
            # TODO(synk): training-mode dropout would need pltpu.prng_seed +
            #             pltpu.stateful_bernoulli.

            # fc3 + sigmoid, computed transposed: (1,20) x (rows,20)^T -> (1,rows)
            # so the result is lane-dense (dense vst; no 1-lane masked stores).
            h3 = lax.dot_general(w3, h2,
                                 dimension_numbers=(((1,), (1,)), ((), ())),
                                 preferred_element_type=jnp.float32)
            row = jax.nn.sigmoid(h3 + b3)
            o_ref[:, :, pl.ds(start, rows)] = (
                row.reshape(1, 1, rows).astype(o_ref.dtype))

    return kernel


def _pick_batch_tile(B, D, itemsize, block_rows):
    """Pick rows-per-grid-step: byte-budgeted, 16-aligned, >=2 steps if possible."""
    if block_rows is None:
        block_rows = max(256, _X_TILE_TARGET_BYTES // (D * itemsize))
    TB = min(int(block_rows), B)
    # v7x megacore: give the 'parallel' batch axis >=2 grid steps whenever the
    # batch is big enough to split (neutral on v5e/v6e which have 1 TC).
    if TB == B and B >= 512:
        TB = -(-B // 2)
    # Cap the streamed x tile at ~4 MiB so double-buffering + chunked
    # intermediates stay far below every generation's VMEM (v7x: 64 MiB/TC).
    cap = max(16, _X_TILE_MAX_BYTES // (D * itemsize))
    TB = min(TB, cap)
    if TB < B:
        TB = max(16, (TB // 16) * 16)   # bf16 packs 16 rows per sublane group
        if TB >= B:
            TB = B
    return TB


def net_forward(x, params, *, block_rows=None):
    """Eval-mode forward of Net.  x: (B, D) float array -> (B, 1) float32."""
    B, D = x.shape

    # Resident MXU weights in bf16 (tiny); VPU-side params stay f32.
    # x is NOT cast here: it streams as-is and is cast inside the kernel.
    w1 = params["w1"].astype(jnp.bfloat16)    # (D, 40)
    w2 = params["w2"].astype(jnp.bfloat16)    # (40, 20)
    w3 = params["w3"].astype(jnp.float32)     # (1, 20) row for the transposed fc3
    b1 = params["b1"].astype(jnp.float32)     # (1, 40)
    b2 = params["b2"].astype(jnp.float32)     # (1, 20)
    b3 = params["b3"].astype(jnp.float32)     # (1, 1) -> SMEM scalar

    TB = _pick_batch_tile(B, D, x.dtype.itemsize, block_rows)
    num_blocks = pl.cdiv(B, TB)
    chunks = tuple((s, min(_CHUNK_ROWS, TB - s)) for s in range(0, TB, _CHUNK_ROWS))

    def const(a):   # full-array block, constant index -> VMEM-resident across steps
        return pl.BlockSpec(a.shape, lambda i: (0,) * a.ndim)

    flops = 2 * B * (D * 40 + 40 * 20 + 20 * 1)
    bytes_accessed = (
        x.size * x.dtype.itemsize                                    # streamed x
        + sum(int(a.size) * a.dtype.itemsize for a in (w1, w2, w3, b1, b2, b3))
        + num_blocks * TB * 4)                                       # f32 output slab
    cost = pl.CostEstimate(flops=flops, transcendentals=2 * B,
                           bytes_accessed=bytes_accessed)

    out = pl.pallas_call(
        _make_kernel(chunks),
        out_shape=jax.ShapeDtypeStruct((num_blocks, 1, TB), jnp.float32),
        grid=(num_blocks,),
        in_specs=[
            pl.BlockSpec((TB, D), lambda i: (i, 0)),   # x: streamed over batch
            const(w1), const(w2), const(w3),           # weights: VMEM-resident
            const(b1), const(b2),                      # biases:  VMEM-resident
            pl.BlockSpec(memory_space=pltpu.SMEM),     # b3: scalar in SMEM
        ],
        # Lane-dense output: one (1, 1, TB) row slab per grid step.
        out_specs=pl.BlockSpec((1, 1, TB), lambda i: (i, 0, 0)),
        compiler_params=pltpu.CompilerParams(
            dimension_semantics=("parallel",),
            vmem_limit_bytes=32 << 20),
        cost_estimate=cost,
    )(x, w1, w2, w3, b1, b2, b3)

    # Re-lay the (num_blocks, 1, TB) slab back to the (B, 1) column (wrapper-side
    # layout plumbing; drops the padded tail of a partial final tile).
    return out.reshape(num_blocks * TB)[:B].reshape(B, 1)


def init_params(input_shape, key):
    """Deterministic init mirroring nn.Linear (w1/w2 stored (in,out); w3 as (1,20) row)."""
    ks = jax.random.split(key, 6)

    def linear(kw, kb, fan_in, fan_out):
        bound = 1.0 / jnp.sqrt(fan_in)
        w = jax.random.uniform(kw, (fan_in, fan_out), jnp.float32, -bound, bound)
        b = jax.random.uniform(kb, (1, fan_out), jnp.float32, -bound, bound)
        return w, b

    w1, b1 = linear(ks[0], ks[1], input_shape, 40)
    w2, b2 = linear(ks[2], ks[3], 40, 20)
    w3t, b3 = linear(ks[4], ks[5], 20, 1)
    return {"w1": w1, "b1": b1, "w2": w2, "b2": b2,
            "w3": w3t.T,            # (1, 20) row for the transposed fc3
            "b3": b3}               # (1, 1)


def _reference(x, p):
    h1 = jnp.maximum(x @ p["w1"] + p["b1"], 0.0)
    h2 = jnp.maximum(h1 @ p["w2"] + p["b2"], 0.0)
    return jax.nn.sigmoid(h2 @ p["w3"].T + p["b3"])


if __name__ == "__main__":
    key = jax.random.PRNGKey(0)
    k_x, k_x2, k_x3, k_p = jax.random.split(key, 4)

    input_shape = 32
    params = init_params(input_shape, k_p)

    # Small single-tile case (TB == B == 8).
    x = jax.random.normal(k_x, (8, input_shape), jnp.float32)
    out = net_forward(x, params)
    jax.block_until_ready(out)
    ref = _reference(x, params)
    assert out.shape == (8, 1)
    # bf16 matmul operands -> looser tolerance than a pure-f32 comparison.
    assert jnp.allclose(out, ref, atol=2e-2, rtol=2e-2)

    # Multi-step grid with a partial final batch tile (B=24, TB -> 16).
    x2 = jax.random.normal(k_x2, (24, input_shape), jnp.float32)
    out2 = net_forward(x2, params, block_rows=8)
    jax.block_until_ready(out2)
    ref2 = _reference(x2, params)
    assert out2.shape == (24, 1)
    assert jnp.allclose(out2, ref2, atol=2e-2, rtol=2e-2)

    # Default byte-budgeted tiling: 2 grid steps x 2 compute chunks each.
    x3 = jax.random.normal(k_x3, (4096, input_shape), jnp.float32)
    out3 = net_forward(x3, params)
    jax.block_until_ready(out3)
    ref3 = _reference(x3, params)
    assert out3.shape == (4096, 1)
    assert jnp.allclose(out3, ref3, atol=2e-2, rtol=2e-2)

    print("KERNEL_OK")
</pallas_src>

<mosaic_0001>
module attributes {stable_mosaic.version = 11 : i64} {
  func.func @kernel(%arg0: i32, %arg1: memref<8x32xf32, #tpu.memory_space<vmem>>, %arg2: memref<32x40xbf16, #tpu.memory_space<vmem>>, %arg3: memref<40x20xbf16, #tpu.memory_space<vmem>>, %arg4: memref<1x20xf32, #tpu.memory_space<vmem>>, %arg5: memref<1x40xf32, #tpu.memory_space<vmem>>, %arg6: memref<1x20xf32, #tpu.memory_space<vmem>>, %arg7: memref<1x1xf32, #tpu.memory_space<smem>>, %arg8: memref<1x1x8xf32, #tpu.memory_space<vmem>>) attributes {dimension_semantics = [#tpu.dimension_semantics<parallel>], iteration_bounds = array<i64: 1>, scalar_prefetch = 0 : i64, scratch_operands = 0 : i64, tpu.core_type = #tpu.core_type<tc>, window_params = [{transform_indices = @transform_0, window_bounds = array<i64: 8, 32>}, {pipeline_mode = #tpu.pipeline_mode<synchronous>, transform_indices = @transform_1, window_bounds = array<i64: 32, 40>}, {pipeline_mode = #tpu.pipeline_mode<synchronous>, transform_indices = @transform_2, window_bounds = array<i64: 40, 20>}, {pipeline_mode = #tpu.pipeline_mode<synchronous>, transform_indices = @transform_3, window_bounds = array<i64: 1, 20>}, {pipeline_mode = #tpu.pipeline_mode<synchronous>, transform_indices = @transform_4, window_bounds = array<i64: 1, 40>}, {pipeline_mode = #tpu.pipeline_mode<synchronous>, transform_indices = @transform_5, window_bounds = array<i64: 1, 20>}, {transform_indices = @transform_6, window_bounds = array<i64: 1, 1>}, {transform_indices = @transform_7, window_bounds = array<i64: 1, 1, 8>}]} {
    %c0 = arith.constant 0 : index
    %c0_0 = arith.constant 0 : index
    %0 = memref.load %arg7[%c0, %c0_0] : memref<1x1xf32, #tpu.memory_space<smem>>
    %c0_1 = arith.constant 0 : index
    %c0_2 = arith.constant 0 : index
    %1 = vector.load %arg5[%c0_1, %c0_2] : memref<1x40xf32, #tpu.memory_space<vmem>>, vector<1x40xf32>
    %c0_3 = arith.constant 0 : index
    %c0_4 = arith.constant 0 : index
    %2 = vector.load %arg6[%c0_3, %c0_4] : memref<1x20xf32, #tpu.memory_space<vmem>>, vector<1x20xf32>
    %c0_5 = arith.constant 0 : index
    %c0_6 = arith.constant 0 : index
    %3 = vector.load %arg4[%c0_5, %c0_6] : memref<1x20xf32, #tpu.memory_space<vmem>>, vector<1x20xf32>
    %c0_7 = arith.constant 0 : index
    %c0_8 = arith.constant 0 : index
    %4 = vector.load %arg1[%c0_7, %c0_8] : memref<8x32xf32, #tpu.memory_space<vmem>>, vector<8x32xf32>
    %5 = arith.truncf %4 : vector<8x32xf32> to vector<8x32xbf16>
    %c0_9 = arith.constant 0 : index
    %c0_10 = arith.constant 0 : index
    %6 = vector.load %arg2[%c0_9, %c0_10] : memref<32x40xbf16, #tpu.memory_space<vmem>>, vector<32x40xbf16>
    %cst = arith.constant dense<0.000000e+00> : vector<8x40xf32>
    %7 = tpu.matmul %5, %6, %cst {dimension_numbers = #tpu.dot_dimension_numbers<[1], [0], [0], [1], [0, 0, 1, 1], [], []>} : vector<8x32xbf16>, vector<32x40xbf16>, vector<8x40xf32> -> vector<8x40xf32>
    %8 = vector.broadcast %1 : vector<1x40xf32> to vector<8x40xf32>
    %9 = arith.addf %7, %8 : vector<8x40xf32>
    %cst_11 = arith.constant 0.000000e+00 : f32
    %10 = vector.broadcast %cst_11 : f32 to vector<8x40xf32>
    %11 = arith.maximumf %9, %10 : vector<8x40xf32>
    %12 = arith.truncf %11 : vector<8x40xf32> to vector<8x40xbf16>
    %c0_12 = arith.constant 0 : index
    %c0_13 = arith.constant 0 : index
    %13 = vector.load %arg3[%c0_12, %c0_13] : memref<40x20xbf16, #tpu.memory_space<vmem>>, vector<40x20xbf16>
    %cst_14 = arith.constant dense<0.000000e+00> : vector<8x20xf32>
    %14 = tpu.matmul %12, %13, %cst_14 {dimension_numbers = #tpu.dot_dimension_numbers<[1], [0], [0], [1], [0, 0, 1, 1], [], []>} : vector<8x40xbf16>, vector<40x20xbf16>, vector<8x20xf32> -> vector<8x20xf32>
    %15 = vector.broadcast %2 : vector<1x20xf32> to vector<8x20xf32>
    %16 = arith.addf %14, %15 : vector<8x20xf32>
    %cst_15 = arith.constant 0.000000e+00 : f32
    %17 = vector.broadcast %cst_15 : f32 to vector<8x20xf32>
    %18 = arith.maximumf %16, %17 : vector<8x20xf32>
    %cst_16 = arith.constant dense<0.000000e+00> : vector<1x8xf32>
    %19 = tpu.matmul %3, %18, %cst_16 {dimension_numbers = #tpu.dot_dimension_numbers<[1], [1], [0], [0], [0, 0, 1, 0], [], []>} : vector<1x20xf32>, vector<8x20xf32>, vector<1x8xf32> -> vector<1x8xf32>
    %20 = vector.broadcast %0 : f32 to vector<1x8xf32>
    %21 = arith.addf %19, %20 : vector<1x8xf32>
    %22 = arith.negf %21 : vector<1x8xf32>
    %23 = math.exp %22 : vector<1x8xf32>
    %cst_17 = arith.constant 1.000000e+00 : f32
    %24 = vector.broadcast %cst_17 : f32 to vector<1x8xf32>
    %25 = arith.addf %24, %23 : vector<1x8xf32>
    %26 = arith.divf %24, %25 : vector<1x8xf32>
    %27 = vector.shape_cast %26 : vector<1x8xf32> to vector<1x1x8xf32>
    %c0_18 = arith.constant 0 : index
    %c0_19 = arith.constant 0 : index
    %c0_20 = arith.constant 0 : index
    %28 = vector.load %arg8[%c0_18, %c0_19, %c0_20] : memref<1x1x8xf32, #tpu.memory_space<vmem>>, vector<1x1x8xf32>
    tpu.vector_store %arg8[%c0_18, %c0_19, %c0_20], %27 {strides = array<i32>} : memref<1x1x8xf32, #tpu.memory_space<vmem>>, vector<1x1x8xf32>,
    return
  }
  func.func @transform_0(%arg0: i32) -> (i32, i32) {
    %c0_i32 = arith.constant 0 : i32
    %c0_i32_0 = arith.constant 0 : i32
    return %arg0, %c0_i32 : i32, i32
  }
  func.func @transform_1(%arg0: i32) -> (i32, i32) {
    %c0_i32 = arith.constant 0 : i32
    %c0_i32_0 = arith.constant 0 : i32
    %c0_i32_1 = arith.constant 0 : i32
    return %c0_i32, %c0_i32_0 : i32, i32
  }
  func.func @transform_2(%arg0: i32) -> (i32, i32) {
    %c0_i32 = arith.constant 0 : i32
    %c0_i32_0 = arith.constant 0 : i32
    %c0_i32_1 = arith.constant 0 : i32
    return %c0_i32, %c0_i32_0 : i32, i32
  }
  func.func @transform_3(%arg0: i32) -> (i32, i32) {
    %c0_i32 = arith.constant 0 : i32
    %c0_i32_0 = arith.constant 0 : i32
    %c0_i32_1 = arith.constant 0 : i32
    return %c0_i32, %c0_i32_0 : i32, i32
  }
  func.func @transform_4(%arg0: i32) -> (i32, i32) {
    %c0_i32 = arith.constant 0 : i32
    %c0_i32_0 = arith.constant 0 : i32
    %c0_i32_1 = arith.constant 0 : i32
    return %c0_i32, %c0_i32_0 : i32, i32
  }
  func.func @transform_5(%arg0: i32) -> (i32, i32) {
    %c0_i32 = arith.constant 0 : i32
    %c0_i32_0 = arith.constant 0 : i32
    %c0_i32_1 = arith.constant 0 : i32
    return %c0_i32, %c0_i32_0 : i32, i32
  }
  func.func @transform_6(%arg0: i32) -> (i32, i32) {
    %c0_i32 = arith.constant 0 : i32
    %c0_i32_0 = arith.constant 0 : i32
    %c0_i32_1 = arith.constant 0 : i32
    return %c0_i32, %c0_i32_0 : i32, i32
  }
  func.func @transform_7(%arg0: i32) -> (i32, i32, i32) {
    %c0_i32 = arith.constant 0 : i32
    %c0_i32_0 = arith.constant 0 : i32
    %c0_i32_1 = arith.constant 0 : i32
    return %arg0, %c0_i32, %c0_i32_0 : i32, i32, i32
  }
}

</mosaic_0001>

<bundles_post_ra>
// kernel: tpu_custom_call.1
= control target key start
LH: loop header
LB: loop body
LE: loop exit
PB: predicated region body
PF: predicated region fallthrough
CT: control target
= control target key end

     0   :  { %s315_s0 = inlined_call_operand.vmem [shape: f32[8,32], index: 0, kind: input, shape index: {}]   ;;  %s316_s1 = inlined_call_operand.vmem [shape: bf16[32,40], index: 1, kind: input, shape index: {}]   ;;  %s317_s2 = inlined_call_operand.vmem [shape: bf16[40,20], index: 2, kind: input, shape index: {}]   ;;  %s318_s3 = inlined_call_operand.vmem [shape: f32[1,20], index: 3, kind: input, shape index: {}]   ;;  %s319_s4 = inlined_call_operand.vmem [shape: f32[1,40], index: 4, kind: input, shape index: {}]   ;;  %s320_s5 = inlined_call_operand.vmem [shape: f32[1,20], index: 5, kind: input, shape index: {}]   ;;  %s321_s6 = inlined_call_operand.<no memory space> [shape: f32[1,1], index: 6, kind: input, shape index: {}]   ;;  %s322_s7 = inlined_call_operand.hbm [shape: f32[1,1,8], index: 7, kind: output, shape index: {}]  }
   0x1   :  { %v205_v0 = vld [vmem:[%s316_s1 + $0x8] sm:$0xff]  ;;  %v204_v1 = vld [vmem:[%s316_s1] sm:$0xff]  ;;  %v77_v2 = vld [vmem:[%s317_s2 + $0x10] sm:$0xf] }
   0x2   :  { %64 = vmatpush.bf16.msra.mxu0 %v205_v0  ;;  %v33_v3 = vld [vmem:[%s315_s0] sm:$0xff]  ;;  %v90_v4 = vunpack.c.l.b16 %v77_v2 }
   0x3   :  { %13 = vsyncpa [#allocation4], 0  ;;  %vm100_vm0 = vcmask 1043456   ;;  %v34_v6 = vpack.c.bf16 %v33_v3, %v33_v3  ;;  %vm54_vm1 = vcmask 261120   ;;  %v207_v8 = vld [vmem:[%s317_s2 + $0x8] sm:$0xff]  ;;  %v206_v9 = vld [vmem:[%s317_s2] sm:$0xff]  ;;  %v118_v22 = vstv %s321_s6 }
   0x4   :  { %v93_v5 = vpack.c.b16 %v90_v4, %v90_v4  ;;  %v209_v10 = vld [vmem:[%s319_s4] ss:$0 sm:$0xff]  ;;  %vm96_vm2 = vcmask 326656   ;;  %vm119_vm3 = vcmask 162816   ;;  %s174_s6 = sshll.u32 %s322_s7, 4  ;;  %vm165_vm7 = vcmask 57344   ;;  %s175_s6 = int_to_ptr.hbm [resolvable:$true] %s174_s6 }
   0x5   :  { %v210_v16 = vld [vmem:[%s320_s5] ss:$0 sm:$0xff] }
   0x6   :  { %65 = vmatpush.bf16.msra.mxu0 %v204_v1  ;;  %v102_v7 = vsel %vm100_vm0, %v93_v5, 0  ;;  %v32_v20 = vld [vmem:[%s318_s3] sm:$0x1]  ;;  %s241_s3 = smov [#allocation3]  }
   0x7   :  { %109 = vmatpush.bf16.msra.mxu1 %v102_v7  ;;  %s172_s5 = sshll.u32 %s241_s3, 4  ;;  %s173_s5 = int_to_ptr.vmem [resolvable:$true] %s172_s5 }
   0x9   :  { %191 = vmatmul.msk.bf16.vlgmr.msra.gmra.mxu0 %vm54_vm1, %v34_v6 }
   0xb   :  { %110 = vmatpush.bf16.msra.mxu1 %v207_v8 }
   0xf   :  { %111 = vmatpush.bf16.msra.mxu1 %v206_v9 }
  0x86   :  { %v67_v11 = vpop.f32.mrf.mxu0 }
  0x87   :  { %v68_v12 = vadd.f32 %v209_v10, %v67_v11 }
  0x89   :  { %v71_v13 = vmax.f32 %v68_v12, 0.0 }
  0x8b   :  { %v72_v14 = vpack.c.bf16 %v71_v13, %v71_v13 }
  0x8d   :  { %200 = vmatmul.msk.bf16.vlgmr.msra.gmra.mxu1 %vm96_vm2, %v72_v14 }
  0x8e   :  { %v69_v15 = vpop.f32.mrf.mxu0 }
 0x10a   :  { %v113_v17 = vpop.f32.mrf.mxu1 }
 0x10b   :  { %v114_v18 = vadd.f32 %v210_v16, %v113_v17 }
 0x10d   :  { %v117_v19 = vmax.f32 %v114_v18, 0.0 }
 0x10f   :  { %201 = vmatpush.xpose.msk.msra.mxu2 %vm119_vm3, %v117_v19 }
 0x112   :  { %v115_v21 = vpop.f32.mrf.mxu1  ;;  %202 = vmatmul.msk.f32.vlgmr.msra.gmra.mxu2 %vm119_vm3, %v32_v20 }
 0x195   :  { %v143_v23 = vpop.f32.mrf.mxu2 }
 0x196   :  { %v144_v24 = vadd.f32 %v143_v23, %v118_v22 }
 0x198   :  { %v203_v25 = vmul.f32 -1.442695, %v144_v24 }
 0x19a   :  { %211 = vpow2.f32 %v203_v25 }
 0x1a0   :  { %v212_v26 = vpop.eup %211 }
 0x1a1   :  { %v149_v27 = vadd.f32 1.0, %v212_v26 }
 0x1a3   :  { %213 = vrcp.f32 %v149_v27  ;;  %v161_v31 = vand.u32 2147483648, %v149_v27  ;;  %v159_v33 = vand.u32 2147483647, %v149_v27  ;;  %vm155_vm5 = vweird.f32 %v149_v27 }
 0x1a5   :  { %v162_v35 = vor.u32 1.1754944e-38, %v161_v31  ;;  %vm160_vm8 = vcmp.eq.f32.partialorder %v159_v33, 8.507059e+37 }
 0x1a9   :  { %v214_v28 = vpop.eup %213 }
 0x1aa   :  { %v151_v29 = vmul.f32 %v214_v28, %v149_v27  ;;  %vm156_vm4 = vweird.f32 %v214_v28 }
 0x1ab   :  { %vm157_vm6 = vmor %vm155_vm5, %vm156_vm4 }
 0x1ac   :  { %v152_v30 = vsub.f32 1.0, %v151_v29 }
 0x1ae   :  { %v153_v32 = vmul.f32 %v214_v28, %v152_v30 }
 0x1b0   :  { %v154_v34 = vadd.f32 %v214_v28, %v153_v32 }
 0x1b2   :  { %v158_v36 = vsel %vm157_vm6, %v214_v28, %v154_v34 }
 0x1b3   :  { %v163_v37 = vsel %vm160_vm8, %v162_v35, %v158_v36 }
 0x1b4   :  { %166 = vst.msk [vmem:[#allocation3] sm:$0x1] %vm165_vm7, %v163_v37 }
 0x1b5   :  { %177 = dma.vmem_to_hbm [thread:$0]  %s173_s5, 16, %s175_s6, [#allocation4]  }
 0x1b6   :  { %239 = dma.done.wait [#allocation4], 16  }
 0x1b7   :  { %240 = vsyncadd [#allocation4], 4294967280 }
 0x1b8   :  { %182 = vsyncpa [#allocation4], 1 }

</bundles_post_ra>
